<compile_context>
chip_gen: v7x
topology: tpu7x:2x2x1
jax: 0.10.0
libtpu: 0.0.40
codegen_flags: <defaults>
</compile_context>

<pallas_src>
import jax
import jax.numpy as jnp
from jax.experimental import pallas as pl
from jax.experimental.pallas import tpu as pltpu

_HIGHEST = jax.lax.Precision.HIGHEST


def _project_kernel(dec_ref, w_ref, q_ref):
    # q = decoder_hidden @ W      (B, H) @ (H, H) -> (B, H)
    q_ref[...] = jnp.dot(
        dec_ref[...], w_ref[...],
        preferred_element_type=jnp.float32,
        precision=_HIGHEST,
    ).astype(q_ref.dtype)


def _attention_kernel(enc_ref, q_ref, ctx_ref, attn_ref):
    enc = enc_ref[...]                      # (Bt, S, H)
    q = q_ref[...]                          # (Bt, H)

    # score[b, s] = sum_h enc[b, s, h] * q[b, h]   -> (Bt, S), lane-major over S
    score = jnp.sum(enc * q[:, None, :], axis=-1)

    # softmax over the sequence axis (lane axis -> single lane reductions)
    m = jnp.max(score, axis=-1, keepdims=True)
    e = jnp.exp(score - m)
    denom = jnp.sum(e, axis=-1, keepdims=True)
    weights = e / denom                     # (Bt, S)

    # context[b, :] = weights[b, :] @ enc[b, :, :]  -> (Bt, H), routed via MXU
    ctx = jnp.einsum(
        "bqs,bsh->bqh", weights[:, None, :], enc,
        preferred_element_type=jnp.float32, precision=_HIGHEST,
    )[:, 0, :]

    ctx_ref[...] = ctx.astype(ctx_ref.dtype)
    attn_ref[...] = weights.astype(attn_ref.dtype)   # lane-dense (Bt, S) store


def luong_general_attention(encoder_outputs, decoder_hidden, W, *, block_b=None):
    """Pallas TPU implementation of LuongGeneralAttention.forward.

    encoder_outputs: (B, S, H) float32
    decoder_hidden : (B, H)    float32
    W              : (H, H)    PyTorch nn.Linear weight (out, in), bias=False
    Returns (context_vector (B, H), attention_weights (B, S)).
    """
    B, S, H = encoder_outputs.shape
    dtype = encoder_outputs.dtype

    # --- Stage 1: q = decoder_hidden @ W (tiny projection kernel) ------------
    q = pl.pallas_call(
        _project_kernel,
        out_shape=jax.ShapeDtypeStruct((B, H), dtype),
        grid=(1,),
        in_specs=[
            pl.BlockSpec((B, H), lambda i: (0, 0)),
            pl.BlockSpec((H, H), lambda i: (0, 0)),
        ],
        out_specs=pl.BlockSpec((B, H), lambda i: (0, 0)),
    )(decoder_hidden, W)

    # --- Stage 2: stream encoder_outputs, several batch rows per grid step ---
    if block_b is None:
        block_b = B if B <= 8 else 8      # fill sublanes / amortize step cost
    num_blocks = -(-B // block_b)
    b_pad = num_blocks * block_b
    enc = encoder_outputs
    if b_pad != B:
        enc = jnp.pad(enc, ((0, b_pad - B), (0, 0), (0, 0)))
        q = jnp.pad(q, ((0, b_pad - B), (0, 0)))

    ctx, attn = pl.pallas_call(
        _attention_kernel,
        out_shape=(
            jax.ShapeDtypeStruct((b_pad, H), dtype),   # context, lane-dense H
            jax.ShapeDtypeStruct((b_pad, S), dtype),   # weights, lane-dense S
        ),
        grid_spec=pltpu.PrefetchScalarGridSpec(
            num_scalar_prefetch=0,
            grid=(num_blocks,),
            in_specs=[
                pl.BlockSpec((block_b, S, H), lambda i: (i, 0, 0)),
                pl.BlockSpec((block_b, H), lambda i: (i, 0)),
            ],
            out_specs=[
                pl.BlockSpec((block_b, H), lambda i: (i, 0)),
                pl.BlockSpec((block_b, S), lambda i: (i, 0)),
            ],
        ),
        compiler_params=pltpu.CompilerParams(
            dimension_semantics=("parallel",)),
    )(enc, q)

    return ctx[:B], attn[:B]


def _reference(encoder_outputs, decoder_hidden, W):
    transformed = jnp.einsum("bsh,oh->bso", encoder_outputs, W, precision=_HIGHEST)
    score = jnp.einsum("bso,bo->bs", transformed, decoder_hidden, precision=_HIGHEST)
    attn = jax.nn.softmax(score, axis=1)
    ctx = jnp.einsum("bs,bsh->bh", attn, encoder_outputs, precision=_HIGHEST)
    return ctx, attn


if __name__ == "__main__":
    B, S, H = 2, 8, 32
    key = jax.random.PRNGKey(0)
    k_enc, k_dec, k_w = jax.random.split(key, 3)

    encoder_outputs = jax.random.normal(k_enc, (B, S, H), dtype=jnp.float32)
    decoder_hidden = jax.random.normal(k_dec, (B, H), dtype=jnp.float32)
    # deterministic Linear(hidden, hidden, bias=False) weight
    W = jax.random.normal(k_w, (H, H), dtype=jnp.float32) * (1.0 / jnp.sqrt(H))

    ctx, attn = luong_general_attention(encoder_outputs, decoder_hidden, W)
    jax.block_until_ready((ctx, attn))

    ctx_ref, attn_ref = _reference(encoder_outputs, decoder_hidden, W)
    assert jnp.allclose(ctx, ctx_ref, atol=1e-4, rtol=1e-4), \
        float(jnp.max(jnp.abs(ctx - ctx_ref)))
    assert jnp.allclose(attn, attn_ref, atol=1e-4, rtol=1e-4), \
        float(jnp.max(jnp.abs(attn - attn_ref)))

    print("KERNEL_OK")
</pallas_src>

<mosaic_0001>
module attributes {stable_mosaic.version = 11 : i64} {
  func.func @_project_kernel(%arg0: i32, %arg1: memref<2x32xf32, #tpu.memory_space<vmem>>, %arg2: memref<32x32xf32, #tpu.memory_space<vmem>>, %arg3: memref<2x32xf32, #tpu.memory_space<vmem>>) attributes {dimension_semantics = [#tpu.dimension_semantics<arbitrary>], iteration_bounds = array<i64: 1>, scalar_prefetch = 0 : i64, scratch_operands = 0 : i64, tpu.core_type = #tpu.core_type<tc>, window_params = [{pipeline_mode = #tpu.pipeline_mode<synchronous>, transform_indices = @transform_0, window_bounds = array<i64: 2, 32>}, {pipeline_mode = #tpu.pipeline_mode<synchronous>, transform_indices = @transform_1, window_bounds = array<i64: 32, 32>}, {pipeline_mode = #tpu.pipeline_mode<synchronous>, transform_indices = @transform_2, window_bounds = array<i64: 2, 32>}]} {
    %c0 = arith.constant 0 : index
    %c0_0 = arith.constant 0 : index
    %0 = vector.load %arg1[%c0, %c0_0] : memref<2x32xf32, #tpu.memory_space<vmem>>, vector<2x32xf32>
    %c0_1 = arith.constant 0 : index
    %c0_2 = arith.constant 0 : index
    %1 = vector.load %arg2[%c0_1, %c0_2] : memref<32x32xf32, #tpu.memory_space<vmem>>, vector<32x32xf32>
    %cst = arith.constant dense<0.000000e+00> : vector<2x32xf32>
    %2 = tpu.matmul %0, %1, %cst {dimension_numbers = #tpu.dot_dimension_numbers<[1], [0], [0], [1], [0, 0, 1, 1], [], []>, precision = #tpu.contract_precision<fp32>} : vector<2x32xf32>, vector<32x32xf32>, vector<2x32xf32> -> vector<2x32xf32>
    %c0_3 = arith.constant 0 : index
    %c0_4 = arith.constant 0 : index
    %3 = vector.load %arg3[%c0_3, %c0_4] : memref<2x32xf32, #tpu.memory_space<vmem>>, vector<2x32xf32>
    tpu.vector_store %arg3[%c0_3, %c0_4], %2 {strides = array<i32>} : memref<2x32xf32, #tpu.memory_space<vmem>>, vector<2x32xf32>,
    return
  }
  func.func @transform_0(%arg0: i32) -> (i32, i32) {
    %c0_i32 = arith.constant 0 : i32
    %c0_i32_0 = arith.constant 0 : i32
    %c0_i32_1 = arith.constant 0 : i32
    return %c0_i32, %c0_i32_0 : i32, i32
  }
  func.func @transform_1(%arg0: i32) -> (i32, i32) {
    %c0_i32 = arith.constant 0 : i32
    %c0_i32_0 = arith.constant 0 : i32
    %c0_i32_1 = arith.constant 0 : i32
    return %c0_i32, %c0_i32_0 : i32, i32
  }
  func.func @transform_2(%arg0: i32) -> (i32, i32) {
    %c0_i32 = arith.constant 0 : i32
    %c0_i32_0 = arith.constant 0 : i32
    %c0_i32_1 = arith.constant 0 : i32
    return %c0_i32, %c0_i32_0 : i32, i32
  }
}

</mosaic_0001>

<bundles_post_ra>
// kernel: tpu_custom_call.1
= control target key start
LH: loop header
LB: loop body
LE: loop exit
PB: predicated region body
PF: predicated region fallthrough
CT: control target
= control target key end

     0   :  { %7 = vsyncpa [#allocation3], 0  ;;  %s861_s0 = inlined_call_operand.hbm [shape: f32[2,32], index: 0, kind: input, shape index: {}]   ;;  %s862_s1 = inlined_call_operand.hbm [shape: f32[32,32], index: 1, kind: input, shape index: {}]   ;;  %s863_s2 = inlined_call_operand.hbm [shape: f32[2,32], index: 2, kind: output, shape index: {}]  }
   0x1   :  { %8 = vsyncpa [#allocation6], 0 }
   0x2   :  { %9 = vsyncpa [#allocation4], 0  ;;  %s771_s9 = smov [#allocation2]   ;;  %s772_s11 = smov [#allocation5]  }
   0x3   :  { %s16_s10 = sshll.u32 %s771_s9, 4  ;;  %s25_s12 = sshll.u32 %s772_s11, 4  ;;  %s17_s10 = int_to_ptr.vmem [resolvable:$true] %s16_s10  ;;  %s794_s12 = int_to_ptr.vmem [resolvable:$true] %s25_s12 }
   0x4   :  { %s699_s15 = scalar_lea.hbm %s861_s0, 32 }
   0x5   :  { %p700_p0 = scmp.ne.s32.totalorder %s861_s0, %s699_s15  ;;  %p703_p1 = scmp.lt.u32.totalorder %s699_s15, %s861_s0 }
   0x7   :  { %p705_p2 = pnand %p703_p1, %p700_p0 }
   0x9   :  { %708 = shalt.err (!%p705_p2)
}
   0xa   :  { %s709_s20 = scalar_lea.vmem %s17_s10, 32  ;;  %p714_p4 = scmp.lt.s32.totalorder %s17_s10, %s17_s10 }
   0xb   :  { %p710_p3 = scmp.ne.s32.totalorder %s17_s10, %s709_s20  ;;  %p715_p5 = scmp.lt.s32.totalorder %s709_s20, %s709_s20 }
   0xd   :  { %p716_p6 = por %p715_p5, %p714_p4 }
   0xf   :  { %p717_p7 = pnand %p716_p6, %p710_p3 }
  0x11   :  { %720 = shalt.err (!%p717_p7)
}
  0x12   :  { %19 = dma.hbm_to_vmem [thread:$0]  %s861_s0, 32, %s17_s10, [#allocation3]  }
  0x13   :  { %s721_s25 = scalar_lea.hbm %s862_s1, 512 }
  0x14   :  { %p722_p8 = scmp.ne.s32.totalorder %s862_s1, %s721_s25  ;;  %p725_p9 = scmp.lt.u32.totalorder %s721_s25, %s862_s1 }
  0x16   :  { %p727_p10 = pnand %p725_p9, %p722_p8 }
  0x18   :  { %730 = shalt.err (!%p727_p10)
}
  0x19   :  { %s731_s30 = scalar_lea.vmem %s794_s12, 512  ;;  %p736_p12 = scmp.lt.s32.totalorder %s794_s12, %s794_s12 }
  0x1a   :  { %p732_p11 = scmp.ne.s32.totalorder %s794_s12, %s731_s30  ;;  %p737_p13 = scmp.lt.s32.totalorder %s731_s30, %s731_s30 }
  0x1c   :  { %p738_p0 = por %p737_p13, %p736_p12 }
  0x1e   :  { %p739_p1 = pnand %p738_p0, %p732_p11 }
  0x20   :  { %742 = shalt.err (!%p739_p1)
}
  0x21   :  { %s773_s0 = smov 128   ;;  %s774_s3 = smov 8  }
  0x22   :  { %31 = dma.hbm_to_vmem [thread:$0]  %s862_s1, 512, %s794_s12, [#allocation6], %s773_s0, %s773_s0, %s774_s3  }
  0x23   :  { %765 = dma.done.wait [#allocation3], 32  }
  0x24   :  { %766 = vsyncadd [#allocation3], 4294967264 }
  0x25   :  { %767 = dma.done.wait [#allocation6], 512  }
  0x26   :  { %768 = vsyncadd [#allocation6], 4294966784  ;;  %v775_v0 = vmov 0.0|0.0   ;;  %vm776_vm0 = vmmov 0   ;;  %v777_v1 = vmov 0.0   ;;  %vm43_vm1 = vcmask 261120  }
  0x27   :  { %646 = vmatprep.subr.bf16.mxu1 %v775_v0  ;;  %664 = vmatprep.subr.bf16.mxu0 %v775_v0  ;;  %v39_v2 = vld [vmem:[#allocation5] sm:$0xff]  ;;  %v40_v3 = vld [vmem:[#allocation5 + $0x8] sm:$0xff]  ;;  %v41_v4 = vld [vmem:[#allocation5 + $0x10] sm:$0xff]  ;;  %s778_s1 = smov [#allocation7]   ;;  %vm532_vm2 = vcmask 254976  }
  0x28   :  { %588 = vmatprep.mubr.msk.f32.mxu1 %vm776_vm0, %v777_v1  ;;  %621 = vmatprep.mubr.msk.f32.mxu0 %vm776_vm0, %v777_v1  ;;  %v48_v5 = vand.u32 4294901760, %v39_v2  ;;  %v51_v6 = vand.u32 4294901760, %v40_v3  ;;  %v42_v7 = vld [vmem:[#allocation5 + $0x18] sm:$0xff]  ;;  %v54_v8 = vand.u32 4294901760, %v41_v4  ;;  %s540_s6 = sshll.u32 %s778_s1, 4  ;;  %s541_s6 = int_to_ptr.vmem [resolvable:$true] %s540_s6 }
  0x29   :  { %v38_v9 = vld [vmem:[#allocation2] sm:$0x3]  ;;  %v57_v10 = vand.u32 4294901760, %v42_v7  ;;  %s743_s7 = scalar_lea.vmem %s541_s6, 32  ;;  %p748_p3 = scmp.lt.s32.totalorder %s541_s6, %s541_s6 }
  0x2a   :  { %v45_v11 = vsel %vm43_vm1, %v38_v9, 0  ;;  %v647_v12 = vpack.c.bf16 %v51_v6, %v48_v5  ;;  %v128_v13 = vsub.f32 %v39_v2, %v48_v5  ;;  %v135_v14 = vsub.f32 %v40_v3, %v51_v6  ;;  %p744_p2 = scmp.ne.s32.totalorder %s541_s6, %s743_s7  ;;  %p749_p4 = scmp.lt.s32.totalorder %s743_s7, %s743_s7 }
  0x2b   :  { %v142_v15 = vsub.f32 %v41_v4, %v54_v8  ;;  %v149_v16 = vsub.f32 %v42_v7, %v57_v10  ;;  %v116_v17 = vand.u32 4294901760, %v45_v11  ;;  %v650_v18 = vpack.c.bf16 %v57_v10, %v54_v8 }
  0x2c   :  { %648 = vmatpush3.bf16.msra.mxu1 %v647_v12  ;;  %666 = vmatpush3.bf16.msra.mxu0 %v647_v12  ;;  %v129_v19 = vand.u32 4294901760, %v128_v13  ;;  %v136_v20 = vand.u32 4294901760, %v135_v14  ;;  %v659_v39 = vpack.c.bf16 %v135_v14, %v128_v13  ;;  %p750_p5 = por %p749_p4, %p748_p3 }
  0x2d   :  { %v143_v21 = vand.u32 4294901760, %v142_v15  ;;  %649 = vmatprep.subr.bf16.mxu1 %v775_v0  ;;  %667 = vmatprep.subr.bf16.mxu0 %v775_v0  ;;  %v117_v22 = vsub.f32 %v45_v11, %v116_v17  ;;  %v150_v23 = vand.u32 4294901760, %v149_v16  ;;  %v662_v40 = vpack.c.bf16 %v149_v16, %v142_v15 }
  0x2e   :  { %v130_v24 = vsub.f32 %v128_v13, %v129_v19  ;;  %v137_v25 = vsub.f32 %v135_v14, %v136_v20  ;;  %v671_v31 = vpack.c.bf16 %v136_v20, %v129_v19  ;;  %p751_p6 = pnand %p750_p5, %p744_p2 }
  0x2f   :  { %v144_v26 = vsub.f32 %v142_v15, %v143_v21  ;;  %v118_v27 = vand.u32 4294901760, %v117_v22  ;;  %v151_v28 = vsub.f32 %v149_v16, %v150_v23  ;;  %v674_v37 = vpack.c.bf16 %v150_v23, %v143_v21 }
  0x30   :  { %651 = vmatpush3.bf16.msra.mxu1 %v650_v18  ;;  %669 = vmatpush3.bf16.msra.mxu0 %v650_v18  ;;  %v131_v29 = vand.u32 4294901760, %v130_v24  ;;  %v138_v30 = vand.u32 4294901760, %v137_v25 }
  0x31   :  { %v119_v32 = vsub.f32 %v117_v22, %v118_v27  ;;  %652 = vmatprep.subr.bf16.mxu1 %v775_v0  ;;  %670 = vmatprep.subr.bf16.mxu0 %v775_v0  ;;  %v145_v34 = vand.u32 4294901760, %v144_v26  ;;  %v152_v35 = vand.u32 4294901760, %v151_v28 }
  0x32   :  { %v653_v33 = vpack.c.bf16 %v138_v30, %v131_v29 }
  0x33   :  { %v120_v36 = vand.u32 4294901760, %v119_v32  ;;  %622 = vmatmul.mubr.f32.vlgmr.msra.gmra.mrb[0].mxu0 %v118_v27  ;;  %v656_v38 = vpack.c.bf16 %v152_v35, %v145_v34 }
  0x34   :  { %672 = vmatpush3.bf16.msra.mxu0 %v671_v31  ;;  %632 = vmatprep.mubr.msk.f32.mxu0 %vm776_vm0, %v777_v1 }
  0x35   :  { %589 = vmatmul.mubr.f32.vlgmr.msra.gmra.mrb[0].mxu1 %v120_v36  ;;  %673 = vmatprep.subr.bf16.mxu0 %v775_v0 }
  0x36   :  { %654 = vmatpush3.bf16.msra.mxu1 %v653_v33  ;;  %599 = vmatprep.mubr.msk.f32.mxu1 %vm776_vm0, %v777_v1 }
  0x37   :  { %655 = vmatprep.subr.bf16.mxu1 %v775_v0 }
  0x38   :  { %675 = vmatpush3.bf16.msra.mxu0 %v674_v37 }
  0x39   :  { %676 = vmatprep.subr.bf16.mxu0 %v775_v0 }
  0x3a   :  { %657 = vmatpush3.bf16.msra.mxu1 %v656_v38 }
  0x3b   :  { %658 = vmatprep.subr.bf16.mxu1 %v775_v0  ;;  %633 = vmatmul.mubr.f32.vlgmr.msra.gmra.mrb[0].mxu0 %v116_v17 }
  0x3c   :  { %678 = vmatpush3.bf16.msra.mxu0 %v647_v12  ;;  %643 = vmatprep.mubr.msk.f32.mxu0 %vm776_vm0, %v777_v1 }
  0x3d   :  { %600 = vmatmul.mubr.f32.vlgmr.msra.gmra.mrb[0].mxu1 %v116_v17  ;;  %679 = vmatprep.subr.bf16.mxu0 %v775_v0 }
  0x3e   :  { %660 = vmatpush3.bf16.msra.mxu1 %v659_v39  ;;  %610 = vmatprep.mubr.msk.f32.mxu1 %vm776_vm0, %v777_v1 }
  0x3f   :  { %661 = vmatprep.subr.bf16.mxu1 %v775_v0 }
  0x40   :  { %681 = vmatpush3.bf16.msra.mxu0 %v650_v18 }
  0x42   :  { %663 = vmatpush3.bf16.msra.mxu1 %v662_v40 }
  0x43   :  { %644 = vmatmul.mubr.f32.vlgmr.msra.gmra.mrb[0].mxu0 %v116_v17 }
  0x45   :  { %611 = vmatmul.mubr.f32.vlgmr.msra.gmra.mrb[0].mxu1 %v117_v22 }
 0x116   :  { %v528_v41 = vpop.f32.mrb[0].mxu0 }
 0x117   :  { %v645_v42 = vpop.f32.mrb[1].mxu0 }
 0x118   :  { %v293_v43 = vpop.f32.mrb[0].mxu1 }
 0x119   :  { %v682_v44 = vadd.f32 %v528_v41, %v293_v43  ;;  %v612_v45 = vpop.f32.mrb[1].mxu1 }
 0x11b   :  { %533 = vst.msk [vmem:[#allocation7] sm:$0x3] %vm532_vm2, %v682_v44 }
 0x11c   :  { %754 = shalt.err (!%p751_p6)
}
 0x11d   :  { %s755_s10 = scalar_lea.hbm %s863_s2, 32 }
 0x11e   :  { %p756_p7 = scmp.ne.s32.totalorder %s863_s2, %s755_s10  ;;  %p759_p8 = scmp.lt.u32.totalorder %s755_s10, %s863_s2 }
 0x120   :  { %p761_p9 = pnand %p759_p8, %p756_p7 }
 0x122   :  { %764 = shalt.err (!%p761_p9)
}
 0x123   :  { %543 = dma.vmem_to_hbm [thread:$0]  %s541_s6, 32, %s863_s2, [#allocation4]  }
 0x124   :  { %769 = dma.done.wait [#allocation4], 32  }
 0x125   :  { %770 = vsyncadd [#allocation4], 4294967264 }
 0x126   :  { %547 = vsyncpa [#allocation3], 1 }
 0x127   :  { %548 = vsyncpa [#allocation6], 1 }
 0x128   :  { %549 = vsyncpa [#allocation4], 1 }

</bundles_post_ra>
